<compile_context>
chip_gen: v6e
topology: v6e:2x2x1
jax: 0.10.0
libtpu: 0.0.40
codegen_flags: <defaults>
</compile_context>

<pallas_src>
import functools

import jax
import jax.numpy as jnp
from jax.experimental import pallas as pl
from jax.experimental.pallas import tpu as pltpu

LANE = 128
SUB_ROWS = 16  # row-tile granularity (safe for bf16 sublane packing)


class EnsembleDecoderOutput:
    def __init__(self, model_dec_outs):
        self.model_dec_outs = tuple(model_dec_outs)

    def squeeze(self, dim=None):
        return EnsembleDecoderOutput(
            [jnp.squeeze(x, axis=dim) for x in self.model_dec_outs]
        )

    def __getitem__(self, index):
        return self.model_dec_outs[index]


def _round_up(x, m):
    return ((x + m - 1) // m) * m


def _cdiv(a, b):
    return -(-a // b)


def _vmem_capacity_bytes():
    try:
        return int(pltpu.get_tpu_info().vmem_capacity_bytes)
    except Exception:
        return 128 * 1024 * 1024  # v5e/v6e default


# ----------------------------------------------------------------------------
# Weight preparation — done ONCE, outside the decode loop.
# ----------------------------------------------------------------------------
def prepare_ensemble_weights(Ws, bs, Vs):
    """Ws: [E,H,H] f32; bs: [E,H] f32; Vs: [E,H,S] f32."""
    E, H, _ = Ws.shape
    S = Vs.shape[-1]
    H_pad = _round_up(H, LANE)
    S_pad = _round_up(S, LANE)
    N_pad = H_pad + S_pad

    # Fused per-model RHS [W_e (H x H_pad) | V_e (H x S_pad)], bf16 for the MXU.
    Wf_e = jnp.concatenate(
        [jnp.pad(Ws, ((0, 0), (0, 0), (0, H_pad - H))),
         jnp.pad(Vs, ((0, 0), (0, 0), (0, S_pad - S)))],
        axis=-1,
    ).astype(jnp.bfloat16)                                       # (E, H, N_pad)

    # Additive bias row: b_e on the first H lanes, 0 on padded-H lanes, 0 on real
    # src lanes, -1e30 on padded src lanes (folds the softmax mask into one add).
    bias_dec = jnp.pad(bs.astype(jnp.float32), ((0, 0), (0, H_pad - H)))
    bias_attn = jnp.concatenate(
        [jnp.zeros((E, S), jnp.float32),
         jnp.full((E, S_pad - S), -1e30, jnp.float32)],
        axis=-1,
    )
    bias_e = jnp.concatenate([bias_dec, bias_attn], axis=-1).reshape(E, 1, N_pad)

    # Flat layout for the collapsed-ensemble fast path: (H, E*N_pad) / (1, E*N_pad).
    Wf_flat = jnp.transpose(Wf_e, (1, 0, 2)).reshape(H, E * N_pad)
    bias_flat = bias_e.reshape(1, E * N_pad)

    return {
        "Wf_e": Wf_e, "bias_e": bias_e,
        "Wf_flat": Wf_flat, "bias_flat": bias_flat,
        "E": E, "H": H, "S": S,
        "H_pad": H_pad, "S_pad": S_pad, "N_pad": N_pad,
    }


# ----------------------------------------------------------------------------
# Kernel A — collapsed ensemble axis (one matmul per row tile covers all E models).
# ----------------------------------------------------------------------------
def _ensemble_fused_kernel(x_ref, wf_ref, bias_ref, dec_ref, attn_ref, *,
                           n_models, h_pad, n_pad):
    x = x_ref[...]                                               # (tm, H)        bf16
    wf = wf_ref[...]                                             # (H, E*N_pad)   bf16

    # Single MXU matmul for every model's dec_out and attention scores; f32 acc.
    fused = jnp.dot(x, wf, preferred_element_type=jnp.float32) + bias_ref[...]

    inv_e = jnp.float32(1.0 / n_models)
    attn_acc = None
    for e in range(n_models):                                    # static unroll over E
        base = e * n_pad
        # dec_out_e = tanh(x @ W_e + b_e); padded-H lanes are sliced off wrapper-side.
        # (bf16-EUP tanh on v6e/v7x is a further micro-opt; kept f32 here for
        #  cross-generation safety — the store itself is bf16.)
        dec_ref[e] = jnp.tanh(fused[:, base:base + h_pad]).astype(dec_ref.dtype)

        # attn_e = softmax(x @ V_e); padded src lanes already masked via the bias.
        scores = fused[:, base + h_pad:base + n_pad]             # (tm, S_pad) f32
        m = jnp.max(scores, axis=-1, keepdims=True)
        p = jnp.exp(scores - m)
        attn = p * pl.reciprocal(jnp.sum(p, axis=-1, keepdims=True), approx=False)
        attn_acc = attn if attn_acc is None else attn_acc + attn

    attn_ref[...] = attn_acc * inv_e


# ----------------------------------------------------------------------------
# Kernel B — fallback: grid = (m_tiles, E), mean-attn accumulated across e.
# ----------------------------------------------------------------------------
def _ensemble_grid_kernel(x_ref, wf_ref, bias_ref, dec_ref, attn_ref, *,
                          weights_resident):
    e = pl.program_id(1)
    n_models = pl.num_programs(1)
    h_pad = dec_ref.shape[-1]

    x = x_ref[...]                                               # (tm, H) bf16
    if weights_resident:
        wf = wf_ref[e]                                           # (H, N_pad) — VMEM-resident stack
        bias = bias_ref[e]                                       # (1, N_pad)
    else:
        wf = wf_ref[0]                                           # streamed per model
        bias = bias_ref[0]

    fused = jnp.dot(x, wf, preferred_element_type=jnp.float32) + bias
    dec_ref[...] = jnp.tanh(fused[:, :h_pad])[None].astype(dec_ref.dtype)

    scores = fused[:, h_pad:]
    m = jnp.max(scores, axis=-1, keepdims=True)
    p = jnp.exp(scores - m)
    attn = p * pl.reciprocal(jnp.sum(p, axis=-1, keepdims=True), approx=False)

    # Running mean over the (innermost, "arbitrary") ensemble axis, accumulated
    # directly in the e-invariant resident output block.
    @pl.when(e == 0)
    def _():
        attn_ref[...] = jnp.zeros_like(attn_ref)

    attn_ref[...] += attn

    @pl.when(e == n_models - 1)
    def _():
        attn_ref[...] = attn_ref[...] * jnp.float32(1.0 / n_models)


# ----------------------------------------------------------------------------
# Wrapper
# ----------------------------------------------------------------------------
def ensemble_decoder_forward(tgt, Ws=None, bs=None, Vs=None, step=None, *,
                             prepared=None, dec_dtype=jnp.float32):
    """tgt: [T, B, H] f32. Either pass raw (Ws, bs, Vs) or a `prepared` dict
    from prepare_ensemble_weights (preferred: build once, reuse every step)."""
    del step  # synthetic per-model decoders ignore `step`
    if prepared is None:
        prepared = prepare_ensemble_weights(Ws, bs, Vs)

    T, B, H = tgt.shape
    E = prepared["E"]
    S = prepared["S"]
    H_pad, S_pad, N_pad = prepared["H_pad"], prepared["S_pad"], prepared["N_pad"]
    M = T * B

    # Generation-aware VMEM budget (~48 MiB on v7x, ~96 MiB on v5e/v6e).
    vmem_cap = _vmem_capacity_bytes()
    vmem_limit = min(vmem_cap * 3 // 4, 100 * 1024 * 1024)
    budget = int(vmem_limit * 0.7)

    # Balanced row tiling: cap by generation, prefer >=2 tiles so the "parallel"
    # m axis can shard across v7x's 2 TensorCores, avoid tail-padding blowup.
    target_tm = 512 if vmem_cap <= 64 * 1024 * 1024 else 1024
    n_tiles = max(1, _cdiv(M, target_tm))
    if n_tiles == 1 and M > 2 * SUB_ROWS:
        n_tiles = 2
    tm = _round_up(_cdiv(M, n_tiles), SUB_ROWS)

    def fused_path_bytes(tm_):
        # weights (x2: conservative double-buffer accounting even though the
        # grid-invariant index_map DMAs them only once) + x/dec/attn tiles (x2)
        # + f32 `fused` intermediate and softmax temps.
        return (2 * (H * E * N_pad * 2 + E * N_pad * 4)
                + 2 * tm_ * H * 2
                + 2 * E * tm_ * H_pad * 2
                + 2 * tm_ * S_pad * 4
                + 2 * tm_ * E * N_pad * 4)

    def grid_path_bytes(tm_, resident):
        w_e = H * N_pad * 2 + N_pad * 4
        w = 2 * (E * w_e if resident else w_e)
        return (w + 2 * tm_ * H * 2 + 2 * tm_ * H_pad * 2
                + 2 * tm_ * S_pad * 4 + 2 * tm_ * N_pad * 4)

    use_fused = fused_path_bytes(tm) <= budget
    weights_resident = True
    if not use_fused:
        weights_resident = grid_path_bytes(tm, True) <= budget
        while grid_path_bytes(tm, weights_resident) > budget and tm > SUB_ROWS:
            tm = _round_up(tm // 2, SUB_ROWS)

    n_tiles = _cdiv(M, tm)
    M_pad = tm * n_tiles

    # Row-major activation slab, bf16 for the MXU.
    x = tgt.reshape(M, H)
    x = jnp.pad(x, ((0, M_pad - M), (0, 0))).astype(jnp.bfloat16)

    out_shape = (
        jax.ShapeDtypeStruct((E, M_pad, H_pad), jnp.bfloat16),   # per-model dec_outs (bf16 writeback)
        jax.ShapeDtypeStruct((M_pad, S_pad), jnp.float32),       # mean attention
    )

    if use_fused:
        kernel = functools.partial(
            _ensemble_fused_kernel, n_models=E, h_pad=H_pad, n_pad=N_pad)
        dec_pad, attn_pad = pl.pallas_call(
            kernel,
            out_shape=out_shape,
            grid_spec=pltpu.PrefetchScalarGridSpec(
                num_scalar_prefetch=0,
                grid=(n_tiles,),
                in_specs=[
                    pl.BlockSpec((tm, H), lambda m: (m, 0)),              # x tile
                    pl.BlockSpec((H, E * N_pad), lambda m: (0, 0)),       # grid-invariant weights
                    pl.BlockSpec((1, E * N_pad), lambda m: (0, 0)),       # grid-invariant bias+mask
                ],
                out_specs=[
                    pl.BlockSpec((E, tm, H_pad), lambda m: (0, m, 0)),    # dec_outs tile (all models)
                    pl.BlockSpec((tm, S_pad), lambda m: (m, 0)),          # mean-attn tile
                ],
            ),
            compiler_params=pltpu.CompilerParams(
                dimension_semantics=("parallel",),
                vmem_limit_bytes=int(vmem_limit),
            ),
        )(x, prepared["Wf_flat"], prepared["bias_flat"])
    else:
        kernel = functools.partial(
            _ensemble_grid_kernel, weights_resident=weights_resident)
        if weights_resident:
            wf_spec = pl.BlockSpec((E, H, N_pad), lambda m, e: (0, 0, 0))     # DMA'd once, VMEM-resident
            b_spec = pl.BlockSpec((E, 1, N_pad), lambda m, e: (0, 0, 0))
        else:
            wf_spec = pl.BlockSpec((1, H, N_pad), lambda m, e: (e, 0, 0))     # streamed per model
            b_spec = pl.BlockSpec((1, 1, N_pad), lambda m, e: (e, 0, 0))
        dec_pad, attn_pad = pl.pallas_call(
            kernel,
            out_shape=out_shape,
            grid_spec=pltpu.PrefetchScalarGridSpec(
                num_scalar_prefetch=0,
                grid=(n_tiles, E),                                # e innermost (accumulator)
                in_specs=[
                    pl.BlockSpec((tm, H), lambda m, e: (m, 0)),
                    wf_spec,
                    b_spec,
                ],
                out_specs=[
                    pl.BlockSpec((1, tm, H_pad), lambda m, e: (e, m, 0)),
                    pl.BlockSpec((tm, S_pad), lambda m, e: (m, 0)),
                ],
            ),
            compiler_params=pltpu.CompilerParams(
                dimension_semantics=("parallel", "arbitrary"),
                vmem_limit_bytes=int(vmem_limit),
            ),
        )(x, prepared["Wf_e"], prepared["bias_e"])

    dec_slabs = dec_pad[:, :M, :H]
    if dec_dtype is not None:
        dec_slabs = dec_slabs.astype(dec_dtype)
    dec_outs = tuple(dec_slabs[i].reshape(T, B, H) for i in range(E))
    mean_attns = {"std": attn_pad[:M, :S].reshape(T, B, S)}
    return EnsembleDecoderOutput(dec_outs), mean_attns


def _reference_forward(tgt, Ws, bs, Vs):
    # Pure-JAX f32 reference of the same synthetic ensemble decoder.
    dec = jnp.tanh(jnp.einsum("tbh,ehk->etbk", tgt, Ws) + bs[:, None, None, :])
    scores = jnp.einsum("tbh,ehs->etbs", tgt, Vs)
    attn = jax.nn.softmax(scores, axis=-1)
    return dec, attn.mean(axis=0)


if __name__ == "__main__":
    key = jax.random.PRNGKey(0)
    E, T, B, H, S = 3, 8, 2, 32, 16   # 3-model ensemble, seq=8, batch=2, hidden=32, src_len=16

    k1, k2, k3, k4 = jax.random.split(key, 4)
    tgt = jax.random.normal(k1, (T, B, H), dtype=jnp.float32)
    Ws = jax.random.normal(k2, (E, H, H), dtype=jnp.float32) * (1.0 / jnp.sqrt(H))
    bs = jax.random.normal(k3, (E, H), dtype=jnp.float32) * 0.1
    Vs = jax.random.normal(k4, (E, H, S), dtype=jnp.float32) * (1.0 / jnp.sqrt(H))

    # Build fused weights ONCE (hoisted out of the decode step), then run forward.
    prepared = prepare_ensemble_weights(Ws, bs, Vs)
    out, attns = ensemble_decoder_forward(tgt, step=None, prepared=prepared)
    jax.block_until_ready(out.model_dec_outs)
    jax.block_until_ready(attns["std"])

    ref_dec, ref_mean_attn = _reference_forward(tgt, Ws, bs, Vs)
    # bf16 matmul inputs + bf16 dec writeback -> loosened tolerance vs f32 reference.
    for i in range(E):
        assert jnp.allclose(out[i], ref_dec[i], atol=3e-2, rtol=3e-2)
    assert jnp.allclose(attns["std"], ref_mean_attn, atol=3e-2, rtol=3e-2)

    print("KERNEL_OK")
</pallas_src>

<mosaic_0001>
module attributes {stable_mosaic.version = 11 : i64} {
  func.func @_ensemble_fused_kernel(%arg0: i32, %arg1: memref<16x32xbf16, #tpu.memory_space<vmem>>, %arg2: memref<32x768xbf16, #tpu.memory_space<vmem>>, %arg3: memref<1x768xf32, #tpu.memory_space<vmem>>, %arg4: memref<3x16x128xbf16, #tpu.memory_space<vmem>>, %arg5: memref<16x128xf32, #tpu.memory_space<vmem>>) attributes {dimension_semantics = [#tpu.dimension_semantics<parallel>], iteration_bounds = array<i64: 1>, scalar_prefetch = 0 : i64, scratch_operands = 0 : i64, tpu.core_type = #tpu.core_type<tc>, window_params = [{transform_indices = @transform_0, window_bounds = array<i64: 16, 32>}, {pipeline_mode = #tpu.pipeline_mode<synchronous>, transform_indices = @transform_1, window_bounds = array<i64: 32, 768>}, {pipeline_mode = #tpu.pipeline_mode<synchronous>, transform_indices = @transform_2, window_bounds = array<i64: 1, 768>}, {transform_indices = @transform_3, window_bounds = array<i64: 3, 16, 128>}, {transform_indices = @transform_4, window_bounds = array<i64: 16, 128>}]} {
    %c0 = arith.constant 0 : index
    %c0_0 = arith.constant 0 : index
    %0 = vector.load %arg1[%c0, %c0_0] : memref<16x32xbf16, #tpu.memory_space<vmem>>, vector<16x32xbf16>
    %c0_1 = arith.constant 0 : index
    %c0_2 = arith.constant 0 : index
    %1 = vector.load %arg2[%c0_1, %c0_2] : memref<32x768xbf16, #tpu.memory_space<vmem>>, vector<32x768xbf16>
    %cst = arith.constant dense<0.000000e+00> : vector<16x768xf32>
    %2 = tpu.matmul %0, %1, %cst {dimension_numbers = #tpu.dot_dimension_numbers<[1], [0], [0], [1], [0, 0, 1, 1], [], []>} : vector<16x32xbf16>, vector<32x768xbf16>, vector<16x768xf32> -> vector<16x768xf32>
    %c0_3 = arith.constant 0 : index
    %c0_4 = arith.constant 0 : index
    %3 = vector.load %arg3[%c0_3, %c0_4] : memref<1x768xf32, #tpu.memory_space<vmem>>, vector<1x768xf32>
    %4 = vector.broadcast %3 : vector<1x768xf32> to vector<16x768xf32>
    %5 = arith.addf %2, %4 : vector<16x768xf32>
    %6 = vector.extract_strided_slice %5 {offsets = [0, 0], sizes = [16, 128], strides = [1, 1]} : vector<16x768xf32> to vector<16x128xf32>
    %7 = math.tanh %6 : vector<16x128xf32>
    %8 = arith.truncf %7 : vector<16x128xf32> to vector<16x128xbf16>
    %c0_5 = arith.constant 0 : index
    %c0_6 = arith.constant 0 : index
    %c0_7 = arith.constant 0 : index
    %9 = vector.load %arg4[%c0_5, %c0_6, %c0_7] : memref<3x16x128xbf16, #tpu.memory_space<vmem>>, vector<1x16x128xbf16>
    %10 = vector.shape_cast %9 : vector<1x16x128xbf16> to vector<16x128xbf16>
    %11 = vector.shape_cast %8 : vector<16x128xbf16> to vector<1x16x128xbf16>
    tpu.vector_store %arg4[%c0_5, %c0_6, %c0_7], %11 {strides = array<i32>} : memref<3x16x128xbf16, #tpu.memory_space<vmem>>, vector<1x16x128xbf16>,
    %12 = vector.extract_strided_slice %5 {offsets = [0, 128], sizes = [16, 128], strides = [1, 1]} : vector<16x768xf32> to vector<16x128xf32>
    %cst_8 = arith.constant dense<0xFF800000> : vector<16xf32>
    %13 = vector.multi_reduction <maximumf>, %12, %cst_8 [1] : vector<16x128xf32> to vector<16xf32>
    %14 = vector.shape_cast %13 : vector<16xf32> to vector<16x1xf32>
    %15 = vector.broadcast %14 : vector<16x1xf32> to vector<16x128xf32>
    %16 = arith.subf %12, %15 : vector<16x128xf32>
    %17 = math.exp %16 : vector<16x128xf32>
    %cst_9 = arith.constant dense<0.000000e+00> : vector<16xf32>
    %18 = vector.multi_reduction <add>, %17, %cst_9 [1] : vector<16x128xf32> to vector<16xf32>
    %19 = vector.shape_cast %18 : vector<16xf32> to vector<16x1xf32>
    %20 = tpu.reciprocal %19 : vector<16x1xf32> -> vector<16x1xf32>
    %21 = vector.broadcast %20 : vector<16x1xf32> to vector<16x128xf32>
    %22 = arith.mulf %17, %21 : vector<16x128xf32>
    %23 = vector.extract_strided_slice %5 {offsets = [0, 256], sizes = [16, 128], strides = [1, 1]} : vector<16x768xf32> to vector<16x128xf32>
    %24 = math.tanh %23 : vector<16x128xf32>
    %25 = arith.truncf %24 : vector<16x128xf32> to vector<16x128xbf16>
    %c1 = arith.constant 1 : index
    %c0_10 = arith.constant 0 : index
    %c0_11 = arith.constant 0 : index
    %26 = vector.load %arg4[%c1, %c0_10, %c0_11] : memref<3x16x128xbf16, #tpu.memory_space<vmem>>, vector<1x16x128xbf16>
    %27 = vector.shape_cast %26 : vector<1x16x128xbf16> to vector<16x128xbf16>
    %28 = vector.shape_cast %25 : vector<16x128xbf16> to vector<1x16x128xbf16>
    tpu.vector_store %arg4[%c1, %c0_10, %c0_11], %28 {strides = array<i32>} : memref<3x16x128xbf16, #tpu.memory_space<vmem>>, vector<1x16x128xbf16>,
    %29 = vector.extract_strided_slice %5 {offsets = [0, 384], sizes = [16, 128], strides = [1, 1]} : vector<16x768xf32> to vector<16x128xf32>
    %cst_12 = arith.constant dense<0xFF800000> : vector<16xf32>
    %30 = vector.multi_reduction <maximumf>, %29, %cst_12 [1] : vector<16x128xf32> to vector<16xf32>
    %31 = vector.shape_cast %30 : vector<16xf32> to vector<16x1xf32>
    %32 = vector.broadcast %31 : vector<16x1xf32> to vector<16x128xf32>
    %33 = arith.subf %29, %32 : vector<16x128xf32>
    %34 = math.exp %33 : vector<16x128xf32>
    %cst_13 = arith.constant dense<0.000000e+00> : vector<16xf32>
    %35 = vector.multi_reduction <add>, %34, %cst_13 [1] : vector<16x128xf32> to vector<16xf32>
    %36 = vector.shape_cast %35 : vector<16xf32> to vector<16x1xf32>
    %37 = tpu.reciprocal %36 : vector<16x1xf32> -> vector<16x1xf32>
    %38 = vector.broadcast %37 : vector<16x1xf32> to vector<16x128xf32>
    %39 = arith.mulf %34, %38 : vector<16x128xf32>
    %40 = arith.addf %22, %39 : vector<16x128xf32>
    %41 = vector.extract_strided_slice %5 {offsets = [0, 512], sizes = [16, 128], strides = [1, 1]} : vector<16x768xf32> to vector<16x128xf32>
    %42 = math.tanh %41 : vector<16x128xf32>
    %43 = arith.truncf %42 : vector<16x128xf32> to vector<16x128xbf16>
    %c2 = arith.constant 2 : index
    %c0_14 = arith.constant 0 : index
    %c0_15 = arith.constant 0 : index
    %44 = vector.load %arg4[%c2, %c0_14, %c0_15] : memref<3x16x128xbf16, #tpu.memory_space<vmem>>, vector<1x16x128xbf16>
    %45 = vector.shape_cast %44 : vector<1x16x128xbf16> to vector<16x128xbf16>
    %46 = vector.shape_cast %43 : vector<16x128xbf16> to vector<1x16x128xbf16>
    tpu.vector_store %arg4[%c2, %c0_14, %c0_15], %46 {strides = array<i32>} : memref<3x16x128xbf16, #tpu.memory_space<vmem>>, vector<1x16x128xbf16>,
    %47 = vector.extract_strided_slice %5 {offsets = [0, 640], sizes = [16, 128], strides = [1, 1]} : vector<16x768xf32> to vector<16x128xf32>
    %cst_16 = arith.constant dense<0xFF800000> : vector<16xf32>
    %48 = vector.multi_reduction <maximumf>, %47, %cst_16 [1] : vector<16x128xf32> to vector<16xf32>
    %49 = vector.shape_cast %48 : vector<16xf32> to vector<16x1xf32>
    %50 = vector.broadcast %49 : vector<16x1xf32> to vector<16x128xf32>
    %51 = arith.subf %47, %50 : vector<16x128xf32>
    %52 = math.exp %51 : vector<16x128xf32>
    %cst_17 = arith.constant dense<0.000000e+00> : vector<16xf32>
    %53 = vector.multi_reduction <add>, %52, %cst_17 [1] : vector<16x128xf32> to vector<16xf32>
    %54 = vector.shape_cast %53 : vector<16xf32> to vector<16x1xf32>
    %55 = tpu.reciprocal %54 : vector<16x1xf32> -> vector<16x1xf32>
    %56 = vector.broadcast %55 : vector<16x1xf32> to vector<16x128xf32>
    %57 = arith.mulf %52, %56 : vector<16x128xf32>
    %58 = arith.addf %40, %57 : vector<16x128xf32>
    %cst_18 = arith.constant 0.333333343 : f32
    %59 = vector.broadcast %cst_18 : f32 to vector<16x128xf32>
    %60 = arith.mulf %58, %59 : vector<16x128xf32>
    %c0_19 = arith.constant 0 : index
    %c0_20 = arith.constant 0 : index
    %61 = vector.load %arg5[%c0_19, %c0_20] : memref<16x128xf32, #tpu.memory_space<vmem>>, vector<16x128xf32>
    tpu.vector_store %arg5[%c0_19, %c0_20], %60 {strides = array<i32>} : memref<16x128xf32, #tpu.memory_space<vmem>>, vector<16x128xf32>,
    return
  }
  func.func @transform_0(%arg0: i32) -> (i32, i32) {
    %c0_i32 = arith.constant 0 : i32
    %c0_i32_0 = arith.constant 0 : i32
    return %arg0, %c0_i32 : i32, i32
  }
  func.func @transform_1(%arg0: i32) -> (i32, i32) {
    %c0_i32 = arith.constant 0 : i32
    %c0_i32_0 = arith.constant 0 : i32
    %c0_i32_1 = arith.constant 0 : i32
    return %c0_i32, %c0_i32_0 : i32, i32
  }
  func.func @transform_2(%arg0: i32) -> (i32, i32) {
    %c0_i32 = arith.constant 0 : i32
    %c0_i32_0 = arith.constant 0 : i32
    %c0_i32_1 = arith.constant 0 : i32
    return %c0_i32, %c0_i32_0 : i32, i32
  }
  func.func @transform_3(%arg0: i32) -> (i32, i32, i32) {
    %c0_i32 = arith.constant 0 : i32
    %c0_i32_0 = arith.constant 0 : i32
    %c0_i32_1 = arith.constant 0 : i32
    return %c0_i32, %arg0, %c0_i32_0 : i32, i32, i32
  }
  func.func @transform_4(%arg0: i32) -> (i32, i32) {
    %c0_i32 = arith.constant 0 : i32
    %c0_i32_0 = arith.constant 0 : i32
    return %arg0, %c0_i32 : i32, i32
  }
}

</mosaic_0001>

<bundles_post_ra>
// kernel: tpu_custom_call.1
= control target key start
LH: loop header
LB: loop body
LE: loop exit
PB: predicated region body
PF: predicated region fallthrough
CT: control target
= control target key end

     0   :  { %10 = vsyncpa [#allocation3], 0  ;;  %s712_s0 = inlined_call_operand.hbm [shape: bf16[16,32], index: 0, kind: input, shape index: {}]   ;;  %s713_s1 = inlined_call_operand.hbm [shape: bf16[32,768], index: 1, kind: input, shape index: {}]   ;;  %s714_s2 = inlined_call_operand.hbm [shape: f32[1,768], index: 2, kind: input, shape index: {}]   ;;  %s715_s3 = inlined_call_operand.hbm [shape: bf16[3,16,128], index: 3, kind: output, shape index: {0}]   ;;  %s716_s4 = inlined_call_operand.hbm [shape: f32[16,128], index: 4, kind: output, shape index: {1}]  }
   0x1   :  { %11 = vsyncpa [#allocation6], 0 }
   0x2   :  { %12 = vsyncpa [#allocation4], 0 }
   0x3   :  { %13 = vsyncpa [#allocation10], 0  ;;  %s654_s15 = smov [#allocation5]  }
   0x4   :  { %s31_s16 = sshll.u32 %s654_s15, 4  ;;  %s32_s16 = int_to_ptr.vmem [resolvable:$true] %s31_s16 }
   0x5   :  { %s554_s17 = scalar_lea.vmem %s32_s16, 1536  ;;  %p559_p1 = scmp.lt.s32.totalorder %s32_s16, %s32_s16 }
   0x6   :  { %p555_p0 = scmp.ne.s32.totalorder %s32_s16, %s554_s17  ;;  %p560_p2 = scmp.lt.s32.totalorder %s554_s17, %s554_s17 }
   0x8   :  { %p561_p3 = por %p560_p2, %p559_p1 }
   0xa   :  { %p562_p4 = pnand %p561_p3, %p555_p0 }
   0xc   :  { %565 = shalt.err (!%p562_p4)
}
   0xd   :  { %s655_s18 = smov 384   ;;  %s656_s19 = smov 24  }
   0xe   :  { %37 = dma.hbm_to_vmem [thread:$0]  %s713_s1, 1536, %s32_s16, [#allocation6], %s655_s18, %s655_s18, %s656_s19  }
   0xf   :  { %s657_s22 = smov [#allocation2]  }
  0x10   :  { %s19_s23 = sshll.u32 %s657_s22, 4  ;;  %s20_s23 = int_to_ptr.vmem [resolvable:$true] %s19_s23 }
  0x11   :  { %s574_s24 = scalar_lea.vmem %s20_s23, 128  ;;  %p579_p6 = scmp.lt.s32.totalorder %s20_s23, %s20_s23 }
  0x12   :  { %p575_p5 = scmp.ne.s32.totalorder %s20_s23, %s574_s24  ;;  %p580_p7 = scmp.lt.s32.totalorder %s574_s24, %s574_s24 }
  0x14   :  { %p581_p8 = por %p580_p7, %p579_p6 }
  0x16   :  { %p582_p9 = pnand %p581_p8, %p575_p5 }
  0x18   :  { %585 = shalt.err (!%p582_p9)
}
  0x19   :  { %s658_s25 = smov 64   ;;  %s659_s26 = smov 4  }
  0x1a   :  { %25 = dma.hbm_to_vmem [thread:$0]  %s712_s0, 128, %s20_s23, [#allocation3], %s658_s25, %s658_s25, %s659_s26  }
  0x1b   :  { %s660_s1 = smov [#allocation7]  }
  0x1c   :  { %s44_s29 = sshll.u32 %s660_s1, 4  ;;  %s45_s29 = int_to_ptr.vmem [resolvable:$true] %s44_s29 }
  0x1d   :  { %s594_s30 = scalar_lea.vmem %s45_s29, 96  ;;  %p599_p11 = scmp.lt.s32.totalorder %s45_s29, %s45_s29 }
  0x1e   :  { %p595_p10 = scmp.ne.s32.totalorder %s45_s29, %s594_s30  ;;  %p600_p12 = scmp.lt.s32.totalorder %s594_s30, %s594_s30 }
  0x20   :  { %p601_p13 = por %p600_p12, %p599_p11 }
  0x22   :  { %p602_p0 = pnand %p601_p13, %p595_p10 }
  0x24   :  { %605 = shalt.err (!%p602_p0)
}
  0x25   :  { %47 = dma.hbm_to_vmem [thread:$0]  %s714_s2, 96, %s45_s29, [#allocation6]  }
  0x26   :  { %646 = dma.done.wait [#allocation3], 128  }
  0x27   :  { %647 = vsyncadd [#allocation3], 4294967168 }
  0x28   :  { %648 = dma.done.wait [#allocation6], 1632  }
  0x29   :  { %649 = vsyncadd [#allocation6], 4294965664  ;;  %v661_v0 = vmov 0   ;;  %v491_v1 = vld [vmem:[#allocation5 + $0x34] ss:$24 sps:$4 sm:$0xff]   ;;  %v503_v9 = vld [vmem:[#allocation2] sm:$0xff]   ;;  %v74_v14 = vlaneseq }
  0x2a   :  { %205 = vmatprep.mubr.bf16.mxu0 %v661_v0  ;;  %248 = vmatprep.mubr.bf16.mxu1 %v661_v0  ;;  %v493_v2 = vld [vmem:[#allocation5 + $0x3c] ss:$24 sps:$4 sm:$0xff]   ;;  %v495_v3 = vld [vmem:[#allocation5 + $0x30] ss:$24 sps:$4 sm:$0xff]   ;;  %v499_v6 = vld [vmem:[#allocation5 + $0xc] ss:$24 sps:$4 sm:$0xff]  }
  0x2b   :  { %185 = vmatprep.subr.bf16.mxu0 %v491_v1  ;;  %v496_v4 = vld [vmem:[#allocation5 + $0x38] ss:$24 sps:$4 sm:$0xff]   ;;  %228 = vmatprep.subr.bf16.mxu1 %v493_v2  ;;  %v497_v5 = vld [vmem:[#allocation5 + $0x4] ss:$24 sps:$4 sm:$0xff]   ;;  %v502_v8 = vld [vmem:[#allocation5 + $0x8] ss:$24 sps:$4 sm:$0xff]  }
  0x2c   :  { %186 = vmatpush1.bf16.msra.mxu0 %v495_v3  ;;  %229 = vmatpush1.bf16.msra.mxu1 %v496_v4  ;;  %v501_v7 = vld [vmem:[#allocation5] ss:$24 sps:$4 sm:$0xff]   ;;  %v506_v10 = vld [vmem:[#allocation5 + $0x44] ss:$24 sps:$4 sm:$0xff]   ;;  %vm169_vm0 = vcmask 261120   ;;  %v75_v15 = vshrl.u32 %v74_v14, 7 }
  0x2d   :  { %187 = vmatprep.subr.bf16.mxu0 %v497_v5  ;;  %230 = vmatprep.subr.bf16.mxu1 %v499_v6  ;;  %v504_v11 = vld [vmem:[#allocation5 + $0x40] ss:$24 sps:$4 sm:$0xff]   ;;  %v509_v12 = vld [vmem:[#allocation5 + $0x14] ss:$24 sps:$4 sm:$0xff]   ;;  %v507_v13 = vld [vmem:[#allocation5 + $0x10] ss:$24 sps:$4 sm:$0xff]  }
  0x2e   :  { %v76_v16 = vsub.s32 0, %v75_v15  ;;  %v72_v17 = vld [vmem:[#allocation7] sm:$0x3f]  ;;  %v84_v18 = vsub.s32 2, %v75_v15  ;;  %v80_v19 = vsub.s32 1, %v75_v15  ;;  %v88_v20 = vsub.s32 3, %v75_v15 }
  0x2f   :  { %v92_v31 = vsub.s32 4, %v75_v15  ;;  %v96_v34 = vsub.s32 5, %v75_v15  ;;  %s662_s0 = smov [#allocation8]  }
  0x30   :  { %188 = vmatpush1.bf16.msra.mxu0 %v501_v7  ;;  %231 = vmatpush1.bf16.msra.mxu1 %v502_v8  ;;  %v77_v21 = vrot.slane %v72_v17, %v76_v16  ;;  %v85_v22 = vrot.slane %v72_v17, %v84_v18  ;;  %v81_v23 = vrot.slane %v72_v17, %v80_v19  ;;  %s407_s2 = sshll.u32 %s662_s0, 4  ;;  %s408_s2 = int_to_ptr.vmem [resolvable:$true] %s407_s2 }
  0x31   :  { %271 = vmatprep.subr.bf16.mxu0 %v506_v10  ;;  %v89_v24 = vrot.slane %v72_v17, %v88_v20  ;;  %v93_v41 = vrot.slane %v72_v17, %v92_v31  ;;  %v97_v44 = vrot.slane %v72_v17, %v96_v34  ;;  %s606_s7 = scalar_lea.vmem %s408_s2, 384  ;;  %p611_p2 = scmp.lt.s32.totalorder %s408_s2, %s408_s2 }
  0x32   :  { %p607_p1 = scmp.ne.s32.totalorder %s408_s2, %s606_s7  ;;  %p612_p3 = scmp.lt.s32.totalorder %s606_s7, %s606_s7 }
  0x33   :  { %449 = vmatmul.mubr.msk.bf16.vlgmr.msra.gmra.mxu0 %vm169_vm0, %v503_v9  ;;  %450 = vmatmul.mubr.msk.bf16.vlgmr.msra.gmra.mxu1 %vm169_vm0, %v503_v9 }
  0x34   :  { %272 = vmatpush1.bf16.msra.mxu0 %v504_v11  ;;  %291 = vmatprep.mubr.bf16.mxu0 %v661_v0  ;;  %p613_p4 = por %p612_p3, %p611_p2 }
  0x35   :  { %273 = vmatprep.subr.bf16.mxu0 %v509_v12 }
  0x36   :  { %p614_p5 = pnand %p613_p4, %p607_p1 }
  0x38   :  { %274 = vmatpush1.bf16.msra.mxu0 %v507_v13 }
  0x3b   :  { %451 = vmatmul.mubr.msk.bf16.vlgmr.msra.gmra.mxu0 %vm169_vm0, %v503_v9 }
  0xf3   :  { %v207_v25 = vpop.f32.mrf.mxu0  ;;  %v250_v26 = vpop.f32.mrf.mxu1 }
  0xf4   :  { %v208_v27 = vadd.f32 %v207_v25, %v77_v21  ;;  %v251_v28 = vadd.f32 %v250_v26, %v85_v22 }
  0xf5   :  { %v209_v29 = vpop.f32.mrf.mxu0  ;;  %v252_v30 = vpop.f32.mrf.mxu1 }
  0xf6   :  { %v210_v32 = vadd.f32 %v209_v29, %v81_v23  ;;  %v253_v33 = vadd.f32 %v252_v30, %v89_v24  ;;  %510 = vtanh.f32 %v208_v27 }
  0xf7   :  { %v211_v35 = vpop.f32.mrf.mxu0  ;;  %v254_v36 = vpop.f32.mrf.mxu1  ;;  %512 = vtanh.f32 %v251_v28 }
  0xf8   :  { %v212_v37 = vadd.f32 %v211_v35, %v77_v21  ;;  %v255_v38 = vadd.f32 %v254_v36, %v85_v22  ;;  %345 = vmax.xlane.f32.xlu1 %v253_v33  ;;  %314 = vmax.xlane.f32.xlu0 %v210_v32 }
  0xf9   :  { %v213_v39 = vpop.f32.mrf.mxu0  ;;  %v256_v40 = vpop.f32.mrf.mxu1 }
  0xfa   :  { %514 = vtanh.f32 %v212_v37  ;;  %v214_v42 = vadd.f32 %v213_v39, %v81_v23  ;;  %v257_v43 = vadd.f32 %v256_v40, %v89_v24 }
  0xfb   :  { %516 = vtanh.f32 %v255_v38  ;;  %v293_v45 = vpop.f32.mrf.mxu0 }
  0xfc   :  { %347 = vmax.xlane.f32.xlu1 %v257_v43  ;;  %316 = vmax.xlane.f32.xlu0 %v214_v42  ;;  %v294_v46 = vadd.f32 %v293_v45, %v93_v41 }
  0xfd   :  { %v295_v47 = vpop.f32.mrf.mxu0 }
  0xfe   :  { %v296_v48 = vadd.f32 %v295_v47, %v97_v44  ;;  %518 = vtanh.f32 %v294_v46 }
  0xff   :  { %v297_v49 = vpop.f32.mrf.mxu0 }
 0x100   :  { %v298_v50 = vadd.f32 %v297_v49, %v93_v41  ;;  %378 = vmax.xlane.f32.xlu0 %v296_v48 }
 0x101   :  { %v299_v51 = vpop.f32.mrf.mxu0 }
 0x102   :  { %520 = vtanh.f32 %v298_v50  ;;  %v300_v52 = vadd.f32 %v299_v51, %v97_v44 }
 0x103   :  { %v511_v53 = vpop.eup %510 }
 0x104   :  { %380 = vmax.xlane.f32.xlu1 %v300_v52  ;;  %v513_v54 = vpop.eup %512 }
 0x107   :  { %v515_v55 = vpop.eup %514 }
 0x108   :  { %v517_v56 = vpop.eup %516  ;;  %v467_v57 = vpack.c.bf16 %v515_v55, %v511_v53 }
 0x109   :  { %v472_v58 = vpack.c.bf16 %v517_v56, %v513_v54 }
 0x10a   :  { %468 = vst [vmem:[#allocation8] sm:$0xff] %v467_v57  }
 0x10b   :  { %473 = vst [vmem:[#allocation8 + $0x8] sm:$0xff] %v472_v58   ;;  %v519_v59 = vpop.eup %518 }
 0x10f   :  { %v521_v60 = vpop.eup %520 }
 0x110   :  { %v477_v61 = vpack.c.bf16 %v521_v60, %v519_v59 }
 0x112   :  { %478 = vst [vmem:[#allocation8 + $0x10] sm:$0xff] %v477_v61  }
 0x181   :  { %v346_v62 = vpop.xlane.xlu1 %345  ;;  %v315_v63 = vpop.xlane.xlu0 %314 }
 0x182   :  { %v349_v0 = vsub.f32 %v253_v33, %v346_v62  ;;  %v318_v1 = vsub.f32 %v210_v32, %v315_v63 }
 0x184   :  { %v320_v2 = vmul.f32 1.442695, %v318_v1  ;;  %v351_v5 = vmul.f32 1.442695, %v349_v0 }
 0x185   :  { %v348_v3 = vpop.xlane.xlu1 %347  ;;  %v317_v4 = vpop.xlane.xlu0 %316 }
 0x186   :  { %v319_v6 = vsub.f32 %v214_v42, %v317_v4  ;;  %522 = vpow2.f32 %v320_v2  ;;  %v350_v7 = vsub.f32 %v257_v43, %v348_v3 }
 0x187   :  { %524 = vpow2.f32 %v351_v5 }
 0x188   :  { %v322_v8 = vmul.f32 1.442695, %v319_v6  ;;  %v353_v11 = vmul.f32 1.442695, %v350_v7 }
 0x189   :  { %v379_v9 = vpop.xlane.xlu0 %378 }
 0x18a   :  { %v382_v10 = vsub.f32 %v296_v48, %v379_v9  ;;  %526 = vpow2.f32 %v322_v8 }
 0x18c   :  { %v384_v12 = vmul.f32 1.442695, %v382_v10 }
 0x18d   :  { %v381_v13 = vpop.xlane.xlu1 %380 }
 0x18e   :  { %528 = vpow2.f32 %v384_v12  ;;  %v383_v14 = vsub.f32 %v300_v52, %v381_v13 }
 0x18f   :  { %530 = vpow2.f32 %v353_v11 }
 0x190   :  { %v386_v15 = vmul.f32 1.442695, %v383_v14 }
 0x192   :  { %532 = vpow2.f32 %v386_v15 }
 0x193   :  { %v523_v16 = vpop.eup %522 }
 0x194   :  { %324 = vadd.xlane.f32.xlu0 %v523_v16  ;;  %v525_v17 = vpop.eup %524 }
 0x197   :  { %v527_v18 = vpop.eup %526 }
 0x198   :  { %355 = vadd.xlane.f32.xlu0 %v525_v17  ;;  %326 = vadd.xlane.f32.xlu1 %v527_v18 }
 0x19b   :  { %v529_v19 = vpop.eup %528 }
 0x19c   :  { %v531_v20 = vpop.eup %530  ;;  %388 = vadd.xlane.f32.xlu0 %v529_v19 }
 0x19d   :  { %357 = vadd.xlane.f32.xlu1 %v531_v20 }
 0x19f   :  { %v533_v21 = vpop.eup %532 }
 0x1a1   :  { %390 = vadd.xlane.f32.xlu1 %v533_v21 }
 0x1a2   :  { %617 = shalt.err (!%p614_p5)
}
 0x1a3   :  { %413 = dma.vmem_to_hbm [thread:$0]  %s408_s2, 384, %s715_s3, [#allocation4], %s658_s25, %s658_s25, %s659_s26  }
 0x1a4   :  { %s663_s3 = smov [#allocation9]  }
 0x1a5   :  { %s419_s10 = sshll.u32 %s663_s3, 4  ;;  %s420_s10 = int_to_ptr.vmem [resolvable:$true] %s419_s10 }
 0x1a6   :  { %s626_s11 = scalar_lea.vmem %s420_s10, 256  ;;  %p631_p7 = scmp.lt.s32.totalorder %s420_s10, %s420_s10 }
 0x1a7   :  { %p627_p6 = scmp.ne.s32.totalorder %s420_s10, %s626_s11  ;;  %p632_p8 = scmp.lt.s32.totalorder %s626_s11, %s626_s11 }
 0x1a9   :  { %p633_p9 = por %p632_p8, %p631_p7 }
 0x1ab   :  { %p634_p10 = pnand %p633_p9, %p627_p6 }
 0x21d   :  { %v325_v22 = vpop.xlane.xlu0 %324 }
 0x21e   :  { %534 = vrcp.f32 %v325_v22 }
 0x221   :  { %v327_v23 = vpop.xlane.xlu1 %326  ;;  %v356_v24 = vpop.xlane.xlu0 %355 }
 0x222   :  { %536 = vrcp.f32 %v356_v24 }
 0x223   :  { %538 = vrcp.f32 %v327_v23 }
 0x225   :  { %v389_v26 = vpop.xlane.xlu0 %388 }
 0x226   :  { %v358_v25 = vpop.xlane.xlu1 %357 }
 0x227   :  { %540 = vrcp.f32 %v358_v25 }
 0x228   :  { %542 = vrcp.f32 %v389_v26 }
 0x22a   :  { %v391_v27 = vpop.xlane.xlu1 %390 }
 0x22b   :  { %544 = vrcp.f32 %v391_v27  ;;  %v535_v28 = vpop.eup %534 }
 0x22c   :  { %v330_v33 = vmul.f32 %v535_v28, %v523_v16 }
 0x22f   :  { %v537_v29 = vpop.eup %536 }
 0x230   :  { %v361_v30 = vmul.f32 %v537_v29, %v525_v17  ;;  %v539_v31 = vpop.eup %538 }
 0x231   :  { %v331_v38 = vmul.f32 %v539_v31, %v527_v18 }
 0x232   :  { %v363_v36 = vadd.f32 %v361_v30, %v330_v33 }
 0x234   :  { %v541_v32 = vpop.eup %540 }
 0x235   :  { %v543_v34 = vpop.eup %542  ;;  %v362_v35 = vmul.f32 %v541_v32, %v531_v20 }
 0x236   :  { %v394_v37 = vmul.f32 %v543_v34, %v529_v19 }
 0x237   :  { %v364_v41 = vadd.f32 %v362_v35, %v331_v38 }
 0x238   :  { %v545_v39 = vpop.eup %544  ;;  %v396_v40 = vadd.f32 %v394_v37, %v363_v36 }
 0x239   :  { %v395_v42 = vmul.f32 %v545_v39, %v533_v21 }
 0x23a   :  { %v398_v43 = vmul.f32 0.33333334, %v396_v40 }
 0x23b   :  { %v397_v44 = vadd.f32 %v395_v42, %v364_v41 }
 0x23c   :  { %400 = vst [vmem:[#allocation9] sm:$0xff] %v398_v43 }
 0x23d   :  { %v399_v45 = vmul.f32 0.33333334, %v397_v44 }
 0x23f   :  { %401 = vst [vmem:[#allocation9 + $0x8] sm:$0xff] %v399_v45 }
 0x240   :  { %637 = shalt.err (!%p634_p10)
}
 0x241   :  { %s664_s12 = smov 128   ;;  %s665_s13 = smov 8  }
 0x242   :  { %425 = dma.vmem_to_hbm [thread:$0]  %s420_s10, 256, %s716_s4, [#allocation10], %s664_s12, %s664_s12, %s665_s13  }
 0x243   :  { %650 = dma.done.wait [#allocation4], 384  }
 0x244   :  { %651 = vsyncadd [#allocation4], 4294966912 }
 0x245   :  { %652 = dma.done.wait [#allocation10], 256  }
 0x246   :  { %653 = vsyncadd [#allocation10], 4294967040 }
 0x247   :  { %432 = vsyncpa [#allocation3], 1 }
 0x248   :  { %433 = vsyncpa [#allocation6], 1 }
 0x249   :  { %434 = vsyncpa [#allocation4], 1 }
 0x24a   :  { %435 = vsyncpa [#allocation10], 1 }

</bundles_post_ra>
